<compile_context>
chip_gen: v7x
topology: tpu7x:2x2x1
jax: 0.10.0
libtpu: 0.0.40
codegen_flags: <defaults>
</compile_context>

<pallas_src>
import functools

import jax
import jax.numpy as jnp
from jax import lax
from jax.experimental import pallas as pl
from jax.experimental.pallas import tpu as pltpu


# ----------------------------- kernels -------------------------------------


def _embed_kernel(word_ref, pos_ref, wp_ref, bp_ref, wi_ref, bi_ref, out_ref):
    # pos_emb = pos @ Wp + bp ; inputs = word + pos_emb ; x = inputs @ Wi + bi
    tt, Bp, W = word_ref.shape
    P = pos_ref.shape[-1]
    w2d = word_ref[...].reshape(tt * Bp, W)          # time-major row order
    p2d = pos_ref[...].reshape(tt * Bp, P)
    pos_emb = jnp.dot(p2d, wp_ref[...], preferred_element_type=jnp.float32)
    inp = w2d + pos_emb + bp_ref[...]
    x = jnp.dot(inp, wi_ref[...], preferred_element_type=jnp.float32) + bi_ref[...]
    out_ref[...] = x.astype(out_ref.dtype)


def _bigru_out_kernel(nsteps_ref, lens_ref, x_ref, h0_ref,
                      wif_ref, bif_ref, whf_ref, bhf_ref,
                      wib_ref, bib_ref, whb_ref, bhb_ref,
                      w1f_ref, w1b_ref, b1_ref, gamma_ref, beta_ref,
                      w2_ref, b2_ref,
                      out_ref,
                      gxf_ref, gxb_ref,
                      *, hidden_size):
    Bp, Hp = h0_ref.shape[1], h0_ref.shape[2]
    G = 3 * Hp
    H = hidden_size

    n_steps = nsteps_ref[0]                          # SMEM scalar: max(cap_lens)
    lens = lens_ref[...]                             # (Bp, 1) int32

    # ---- non-recurrent prologue: ONE fused input-gate projection per
    # direction over all (padded) time steps / batches, off the serial path.
    x2d = x_ref[...]                                 # (Tp*Bp, Hp), time-major rows
    gxf_ref[...] = (jnp.dot(x2d, wif_ref[...], preferred_element_type=jnp.float32)
                    + bif_ref[...])
    gxb_ref[...] = (jnp.dot(x2d, wib_ref[...], preferred_element_type=jnp.float32)
                    + bib_ref[...])

    # Hoist loop-invariant weight loads and bias broadcasts off the recurrence.
    whf = whf_ref[...]
    whb = whb_ref[...]
    bhf_b = jnp.broadcast_to(bhf_ref[...], (Bp, G))
    bhb_b = jnp.broadcast_to(bhb_ref[...], (Bp, G))

    def gru_combine(gx, gh, h):
        # fused gate layout [r | z | n]; each gate starts at a lane-aligned
        # multiple of Hp, so these slices are free vreg selects.
        r = jax.nn.sigmoid(gx[:, :Hp] + gh[:, :Hp])
        z = jax.nn.sigmoid(gx[:, Hp:2 * Hp] + gh[:, Hp:2 * Hp])
        n = jnp.tanh(gx[:, 2 * Hp:] + r * gh[:, 2 * Hp:])
        return (1.0 - z) * n + z * h

    # ---- serial recurrence, bounded by max(cap_lens): forward step t and
    # backward step (n_steps-1-t) interleaved so the two independent h @ Wh
    # matmuls overlap.  Per-sample length masking reproduces
    # pack_padded_sequence's final hidden states exactly.
    def step(t, carry):
        hf, hb = carry
        tb = n_steps - 1 - t
        rf = pl.multiple_of(t * Bp, Bp)
        rb = pl.multiple_of(tb * Bp, Bp)
        gxf = gxf_ref[pl.ds(rf, Bp), :]
        gxb = gxb_ref[pl.ds(rb, Bp), :]
        ghf = jnp.dot(hf, whf, preferred_element_type=jnp.float32) + bhf_b
        ghb = jnp.dot(hb, whb, preferred_element_type=jnp.float32) + bhb_b
        hf_new = gru_combine(gxf, ghf, hf)
        hb_new = gru_combine(gxb, ghb, hb)
        hf = jnp.where(t < lens, hf_new, hf)
        hb = jnp.where(tb < lens, hb_new, hb)
        return hf, hb

    hf, hb = lax.fori_loop(0, n_steps, step, (h0_ref[0], h0_ref[1]))

    # output_net: Linear(2H,H) as two half matmuls (no lane concat)
    #             -> LayerNorm over the H valid lanes -> LeakyReLU(0.2)
    #             -> Linear(H,O).  Padded lanes of h1 are exactly zero.
    h1 = (jnp.dot(hf, w1f_ref[...], preferred_element_type=jnp.float32)
          + jnp.dot(hb, w1b_ref[...], preferred_element_type=jnp.float32)
          + b1_ref[...])
    mean = jnp.sum(h1, axis=-1, keepdims=True) * (1.0 / H)
    valid = lax.broadcasted_iota(jnp.int32, (1, Hp), 1) < H
    centered = jnp.where(valid, h1 - mean, 0.0)
    var = jnp.sum(centered * centered, axis=-1, keepdims=True) * (1.0 / H)
    hn = centered * lax.rsqrt(var + 1e-5) * gamma_ref[...] + beta_ref[...]
    act = jnp.where(hn > 0, hn, 0.2 * hn)
    out = jnp.dot(act, w2_ref[...], preferred_element_type=jnp.float32) + b2_ref[...]
    out_ref[...] = out.astype(out_ref.dtype)


# ----------------------------- wrapper --------------------------------------


def _round_up(x, m):
    return (x + m - 1) // m * m


def _time_tile(t_pad, max_tile=128):
    """Largest 8-aligned divisor of t_pad, capped at max_tile."""
    t = min(t_pad, max_tile)
    t -= t % 8
    t = max(t, 8)
    while t_pad % t:
        t -= 8
    return t


def _pad_to(x, shape):
    return jnp.pad(x, [(0, s - d) for d, s in zip(x.shape, shape)])


def _fuse_pad_gate_w(w, hp):
    """(3, H, H) per-gate weights -> lane-aligned fused (Hp, 3*Hp), gates [r,z,n]."""
    h = w.shape[-1]
    out = jnp.zeros((hp, 3 * hp), jnp.float32)
    for g in range(3):
        out = out.at[:h, g * hp:g * hp + h].set(w[g])
    return out


def _fuse_pad_gate_b(b, hp):
    """(3, 1, H) per-gate biases -> lane-aligned fused (1, 3*Hp)."""
    h = b.shape[-1]
    out = jnp.zeros((1, 3 * hp), jnp.float32)
    for g in range(3):
        out = out.at[0, g * hp:g * hp + h].set(b[g, 0])
    return out


def text_encoder_bigru_co(params, word_embs, pos_onehot, cap_lens):
    B, T, W = word_embs.shape
    P = pos_onehot.shape[-1]
    H = params["wi"].shape[-1]
    O = params["w2"].shape[-1]

    Hp = _round_up(H, 128)       # lane-aligned hidden size
    Bp = _round_up(B, 8)         # sublane-aligned batch
    Tp = _round_up(T, 8)

    # Transpose-to-time-major fused into the (already required) pad copy of
    # the small inputs; x never round-trips HBM for a standalone transpose.
    word_tm = _pad_to(jnp.transpose(word_embs.astype(jnp.float32), (1, 0, 2)),
                      (Tp, Bp, W))
    pos_tm = _pad_to(jnp.transpose(pos_onehot.astype(jnp.float32), (1, 0, 2)),
                     (Tp, Bp, P))
    wi_p = _pad_to(params["wi"], (W, Hp))
    bi_p = _pad_to(params["bi"], (1, Hp))

    # --- embedding + Linear(W,H): pipelined over 8-aligned time tiles,
    # writes the time-major, lane-dense (Tp*Bp, Hp) activation directly. -----
    tt = _time_tile(Tp)
    x_tm = pl.pallas_call(
        _embed_kernel,
        out_shape=jax.ShapeDtypeStruct((Tp * Bp, Hp), jnp.float32),
        grid=(Tp // tt,),
        in_specs=[
            pl.BlockSpec((tt, Bp, W), lambda i: (i, 0, 0)),
            pl.BlockSpec((tt, Bp, P), lambda i: (i, 0, 0)),
            pl.BlockSpec((P, W), lambda i: (0, 0)),
            pl.BlockSpec((1, W), lambda i: (0, 0)),
            pl.BlockSpec((W, Hp), lambda i: (0, 0)),
            pl.BlockSpec((1, Hp), lambda i: (0, 0)),
        ],
        out_specs=pl.BlockSpec((tt * Bp, Hp), lambda i: (i, 0)),
        compiler_params=pltpu.CompilerParams(
            dimension_semantics=("parallel",),
            vmem_limit_bytes=32 * 1024 * 1024),
    )(word_tm, pos_tm, params["wp"], params["bp"], wi_p, bi_p)

    # --- BiGRU recurrence + output head (single program, VMEM resident) -----
    lens32 = cap_lens.astype(jnp.int32)
    lens = jnp.zeros((Bp,), jnp.int32).at[:B].set(lens32).reshape(Bp, 1)
    n_steps = jnp.minimum(jnp.max(lens32), T).astype(jnp.int32).reshape(1)
    h0 = jnp.broadcast_to(_pad_to(params["h0"], (2, 1, Hp)), (2, Bp, Hp))

    smem = pl.BlockSpec(memory_space=pltpu.MemorySpace.SMEM)
    vmem = pl.BlockSpec(memory_space=pltpu.MemorySpace.VMEM)

    out_full = pl.pallas_call(
        functools.partial(_bigru_out_kernel, hidden_size=H),
        out_shape=jax.ShapeDtypeStruct((Bp, O), jnp.float32),
        in_specs=[smem] + [vmem] * 18,
        out_specs=vmem,
        scratch_shapes=[pltpu.VMEM((Tp * Bp, 3 * Hp), jnp.float32),
                        pltpu.VMEM((Tp * Bp, 3 * Hp), jnp.float32)],
        compiler_params=pltpu.CompilerParams(vmem_limit_bytes=32 * 1024 * 1024),
    )(n_steps, lens, x_tm, h0,
      _fuse_pad_gate_w(params["wi_gru_f"], Hp), _fuse_pad_gate_b(params["bi_gru_f"], Hp),
      _fuse_pad_gate_w(params["wh_gru_f"], Hp), _fuse_pad_gate_b(params["bh_gru_f"], Hp),
      _fuse_pad_gate_w(params["wi_gru_b"], Hp), _fuse_pad_gate_b(params["bi_gru_b"], Hp),
      _fuse_pad_gate_w(params["wh_gru_b"], Hp), _fuse_pad_gate_b(params["bh_gru_b"], Hp),
      _pad_to(params["w1"][:H], (Hp, Hp)), _pad_to(params["w1"][H:], (Hp, Hp)),
      _pad_to(params["b1"], (1, Hp)),
      _pad_to(params["gamma"], (1, Hp)), _pad_to(params["beta"], (1, Hp)),
      _pad_to(params["w2"], (Hp, O)), params["b2"])
    return out_full[:B]


# ----------------------------- params / reference ---------------------------


def init_params(key, word_size, pos_size, hidden_size, output_size):
    keys = jax.random.split(key, 13)
    H = hidden_size

    def xavier(k, fan_in, fan_out):      # xavier_normal_, stored as (in, out)
        std = (2.0 / (fan_in + fan_out)) ** 0.5
        return std * jax.random.normal(k, (fan_in, fan_out), jnp.float32)

    def gru_w(k, fan_in, fan_out):       # 3 gates [r, z, n], (in, out) each
        std = 1.0 / (fan_out ** 0.5)
        return std * jax.random.normal(k, (3, fan_in, fan_out), jnp.float32)

    return dict(
        wp=xavier(keys[0], pos_size, word_size),
        bp=jnp.zeros((1, word_size), jnp.float32),
        wi=xavier(keys[1], word_size, H),
        bi=jnp.zeros((1, H), jnp.float32),
        wi_gru_f=gru_w(keys[2], H, H), wh_gru_f=gru_w(keys[3], H, H),
        bi_gru_f=0.1 * jax.random.normal(keys[4], (3, 1, H), jnp.float32),
        bh_gru_f=0.1 * jax.random.normal(keys[5], (3, 1, H), jnp.float32),
        wi_gru_b=gru_w(keys[6], H, H), wh_gru_b=gru_w(keys[7], H, H),
        bi_gru_b=0.1 * jax.random.normal(keys[8], (3, 1, H), jnp.float32),
        bh_gru_b=0.1 * jax.random.normal(keys[9], (3, 1, H), jnp.float32),
        w1=xavier(keys[10], 2 * H, H),
        b1=jnp.zeros((1, H), jnp.float32),
        gamma=jnp.ones((1, H), jnp.float32),
        beta=jnp.zeros((1, H), jnp.float32),
        w2=xavier(keys[11], H, output_size),
        b2=jnp.zeros((1, output_size), jnp.float32),
        h0=jax.random.normal(keys[12], (2, 1, H), jnp.float32),  # nn.Parameter(randn(2,1,H))
    )


def reference(params, word_embs, pos_onehot, cap_lens):
    """Pure-JAX reference mirroring the PyTorch forward pass."""
    pos_embs = pos_onehot @ params["wp"] + params["bp"]
    x = (word_embs + pos_embs) @ params["wi"] + params["bi"]      # (B, T, H)
    B, T, H = x.shape
    lens = cap_lens.astype(jnp.int32)

    def cell(x_t, h, wi, wh, bi, bh):
        r = jax.nn.sigmoid(x_t @ wi[0] + bi[0] + h @ wh[0] + bh[0])
        z = jax.nn.sigmoid(x_t @ wi[1] + bi[1] + h @ wh[1] + bh[1])
        n = jnp.tanh(x_t @ wi[2] + bi[2] + r * (h @ wh[2] + bh[2]))
        return (1 - z) * n + z * h

    hf = jnp.broadcast_to(params["h0"][0], (B, H))
    for t in range(T):
        hn = cell(x[:, t], hf, params["wi_gru_f"], params["wh_gru_f"],
                  params["bi_gru_f"], params["bh_gru_f"])
        hf = jnp.where((t < lens)[:, None], hn, hf)
    hb = jnp.broadcast_to(params["h0"][1], (B, H))
    for t in range(T - 1, -1, -1):
        hn = cell(x[:, t], hb, params["wi_gru_b"], params["wh_gru_b"],
                  params["bi_gru_b"], params["bh_gru_b"])
        hb = jnp.where((t < lens)[:, None], hn, hb)

    gl = jnp.concatenate([hf, hb], axis=-1)
    h1 = gl @ params["w1"] + params["b1"]
    mean = h1.mean(-1, keepdims=True)
    var = ((h1 - mean) ** 2).mean(-1, keepdims=True)
    hn = (h1 - mean) / jnp.sqrt(var + 1e-5) * params["gamma"] + params["beta"]
    act = jnp.where(hn > 0, hn, 0.2 * hn)
    return act @ params["w2"] + params["b2"]


# ----------------------------- main ------------------------------------------


if __name__ == "__main__":
    B, T = 2, 16
    word_size, pos_size, hidden_size, output_size = 32, 16, 32, 16

    key = jax.random.PRNGKey(0)
    kp, kw, kpos = jax.random.split(key, 3)
    params = init_params(kp, word_size, pos_size, hidden_size, output_size)

    word_embs = jax.random.normal(kw, (B, T, word_size), jnp.float32)
    pos_onehot = jax.nn.one_hot(
        jax.random.randint(kpos, (B, T), 0, pos_size), pos_size, dtype=jnp.float32)
    cap_lens = jnp.array([16, 11], dtype=jnp.int32)   # sorted descending, as in pack_padded_sequence

    out = text_encoder_bigru_co(params, word_embs, pos_onehot, cap_lens)
    out = jax.block_until_ready(out)

    ref = reference(params, word_embs, pos_onehot, cap_lens)
    assert out.shape == (B, output_size)
    assert jnp.allclose(out, ref, rtol=2e-2, atol=2e-3), (out, ref)
    print("KERNEL_OK")
</pallas_src>

<mosaic_0001>
module attributes {stable_mosaic.version = 11 : i64} {
  func.func @_embed_kernel(%arg0: i32, %arg1: memref<16x8x32xf32, #tpu.memory_space<vmem>>, %arg2: memref<16x8x16xf32, #tpu.memory_space<vmem>>, %arg3: memref<16x32xf32, #tpu.memory_space<vmem>>, %arg4: memref<1x32xf32, #tpu.memory_space<vmem>>, %arg5: memref<32x128xf32, #tpu.memory_space<vmem>>, %arg6: memref<1x128xf32, #tpu.memory_space<vmem>>, %arg7: memref<128x128xf32, #tpu.memory_space<vmem>>) attributes {dimension_semantics = [#tpu.dimension_semantics<parallel>], iteration_bounds = array<i64: 1>, scalar_prefetch = 0 : i64, scratch_operands = 0 : i64, tpu.core_type = #tpu.core_type<tc>, window_params = [{transform_indices = @transform_0, window_bounds = array<i64: 16, 8, 32>}, {transform_indices = @transform_1, window_bounds = array<i64: 16, 8, 16>}, {pipeline_mode = #tpu.pipeline_mode<synchronous>, transform_indices = @transform_2, window_bounds = array<i64: 16, 32>}, {pipeline_mode = #tpu.pipeline_mode<synchronous>, transform_indices = @transform_3, window_bounds = array<i64: 1, 32>}, {pipeline_mode = #tpu.pipeline_mode<synchronous>, transform_indices = @transform_4, window_bounds = array<i64: 32, 128>}, {pipeline_mode = #tpu.pipeline_mode<synchronous>, transform_indices = @transform_5, window_bounds = array<i64: 1, 128>}, {transform_indices = @transform_6, window_bounds = array<i64: 128, 128>}]} {
    %c0 = arith.constant 0 : index
    %c0_0 = arith.constant 0 : index
    %c0_1 = arith.constant 0 : index
    %0 = vector.load %arg1[%c0, %c0_0, %c0_1] : memref<16x8x32xf32, #tpu.memory_space<vmem>>, vector<16x8x32xf32>
    %1 = vector.shape_cast %0 : vector<16x8x32xf32> to vector<128x32xf32>
    %c0_2 = arith.constant 0 : index
    %c0_3 = arith.constant 0 : index
    %c0_4 = arith.constant 0 : index
    %2 = vector.load %arg2[%c0_2, %c0_3, %c0_4] : memref<16x8x16xf32, #tpu.memory_space<vmem>>, vector<16x8x16xf32>
    %3 = vector.shape_cast %2 : vector<16x8x16xf32> to vector<128x16xf32>
    %c0_5 = arith.constant 0 : index
    %c0_6 = arith.constant 0 : index
    %4 = vector.load %arg3[%c0_5, %c0_6] : memref<16x32xf32, #tpu.memory_space<vmem>>, vector<16x32xf32>
    %cst = arith.constant dense<0.000000e+00> : vector<128x32xf32>
    %5 = tpu.matmul %3, %4, %cst {dimension_numbers = #tpu.dot_dimension_numbers<[1], [0], [0], [1], [0, 0, 1, 1], [], []>} : vector<128x16xf32>, vector<16x32xf32>, vector<128x32xf32> -> vector<128x32xf32>
    %6 = arith.addf %1, %5 : vector<128x32xf32>
    %c0_7 = arith.constant 0 : index
    %c0_8 = arith.constant 0 : index
    %7 = vector.load %arg4[%c0_7, %c0_8] : memref<1x32xf32, #tpu.memory_space<vmem>>, vector<1x32xf32>
    %8 = vector.broadcast %7 : vector<1x32xf32> to vector<128x32xf32>
    %9 = arith.addf %6, %8 : vector<128x32xf32>
    %c0_9 = arith.constant 0 : index
    %c0_10 = arith.constant 0 : index
    %10 = vector.load %arg5[%c0_9, %c0_10] : memref<32x128xf32, #tpu.memory_space<vmem>>, vector<32x128xf32>
    %cst_11 = arith.constant dense<0.000000e+00> : vector<128x128xf32>
    %11 = tpu.matmul %9, %10, %cst_11 {dimension_numbers = #tpu.dot_dimension_numbers<[1], [0], [0], [1], [0, 0, 1, 1], [], []>} : vector<128x32xf32>, vector<32x128xf32>, vector<128x128xf32> -> vector<128x128xf32>
    %c0_12 = arith.constant 0 : index
    %c0_13 = arith.constant 0 : index
    %12 = vector.load %arg6[%c0_12, %c0_13] : memref<1x128xf32, #tpu.memory_space<vmem>>, vector<1x128xf32>
    %13 = vector.broadcast %12 : vector<1x128xf32> to vector<128x128xf32>
    %14 = arith.addf %11, %13 : vector<128x128xf32>
    %c0_14 = arith.constant 0 : index
    %c0_15 = arith.constant 0 : index
    %15 = vector.load %arg7[%c0_14, %c0_15] : memref<128x128xf32, #tpu.memory_space<vmem>>, vector<128x128xf32>
    tpu.vector_store %arg7[%c0_14, %c0_15], %14 {strides = array<i32>} : memref<128x128xf32, #tpu.memory_space<vmem>>, vector<128x128xf32>,
    return
  }
  func.func @transform_0(%arg0: i32) -> (i32, i32, i32) {
    %c0_i32 = arith.constant 0 : i32
    %c0_i32_0 = arith.constant 0 : i32
    %c0_i32_1 = arith.constant 0 : i32
    return %arg0, %c0_i32, %c0_i32_0 : i32, i32, i32
  }
  func.func @transform_1(%arg0: i32) -> (i32, i32, i32) {
    %c0_i32 = arith.constant 0 : i32
    %c0_i32_0 = arith.constant 0 : i32
    %c0_i32_1 = arith.constant 0 : i32
    return %arg0, %c0_i32, %c0_i32_0 : i32, i32, i32
  }
  func.func @transform_2(%arg0: i32) -> (i32, i32) {
    %c0_i32 = arith.constant 0 : i32
    %c0_i32_0 = arith.constant 0 : i32
    %c0_i32_1 = arith.constant 0 : i32
    return %c0_i32, %c0_i32_0 : i32, i32
  }
  func.func @transform_3(%arg0: i32) -> (i32, i32) {
    %c0_i32 = arith.constant 0 : i32
    %c0_i32_0 = arith.constant 0 : i32
    %c0_i32_1 = arith.constant 0 : i32
    return %c0_i32, %c0_i32_0 : i32, i32
  }
  func.func @transform_4(%arg0: i32) -> (i32, i32) {
    %c0_i32 = arith.constant 0 : i32
    %c0_i32_0 = arith.constant 0 : i32
    %c0_i32_1 = arith.constant 0 : i32
    return %c0_i32, %c0_i32_0 : i32, i32
  }
  func.func @transform_5(%arg0: i32) -> (i32, i32) {
    %c0_i32 = arith.constant 0 : i32
    %c0_i32_0 = arith.constant 0 : i32
    %c0_i32_1 = arith.constant 0 : i32
    return %c0_i32, %c0_i32_0 : i32, i32
  }
  func.func @transform_6(%arg0: i32) -> (i32, i32) {
    %c0_i32 = arith.constant 0 : i32
    %c0_i32_0 = arith.constant 0 : i32
    return %arg0, %c0_i32 : i32, i32
  }
}

</mosaic_0001>

<bundles_post_ra>
// kernel: tpu_custom_call.1
= control target key start
LH: loop header
LB: loop body
LE: loop exit
PB: predicated region body
PF: predicated region fallthrough
CT: control target
= control target key end

     0   :  { %11 = vsyncpa [#allocation3], 0  ;;  %s1042_s0 = inlined_call_operand.hbm [shape: f32[16,8,32], index: 0, kind: input, shape index: {}]   ;;  %s1043_s1 = inlined_call_operand.hbm [shape: f32[16,8,16], index: 1, kind: input, shape index: {}]   ;;  %s1044_s2 = inlined_call_operand.hbm [shape: f32[16,32], index: 2, kind: input, shape index: {}]   ;;  %s1045_s3 = inlined_call_operand.vmem [shape: f32[1,32], index: 3, kind: input, shape index: {}]   ;;  %s1046_s4 = inlined_call_operand.hbm [shape: f32[32,128], index: 4, kind: input, shape index: {}]   ;;  %s1047_s5 = inlined_call_operand.vmem [shape: f32[1,128], index: 5, kind: input, shape index: {}]   ;;  %s1048_s6 = inlined_call_operand.hbm [shape: f32[128,128], index: 6, kind: output, shape index: {}]  }
   0x1   :  { %12 = vsyncpa [#allocation6], 0 }
   0x2   :  { %13 = vsyncpa [#allocation9], 0 }
   0x3   :  { %14 = vsyncpa [#allocation4], 0  ;;  %s855_s21 = smov [#allocation5]   ;;  %s856_s23 = smov [#allocation2]  }
   0x4   :  { %s32_s22 = sshll.u32 %s855_s21, 4  ;;  %s20_s24 = sshll.u32 %s856_s23, 4  ;;  %s33_s22 = int_to_ptr.vmem [resolvable:$true] %s32_s22  ;;  %s897_s24 = int_to_ptr.vmem [resolvable:$true] %s20_s24 }
   0x5   :  { %s737_s27 = scalar_lea.hbm %s1043_s1, 2048 }
   0x6   :  { %p738_p0 = scmp.ne.s32.totalorder %s1043_s1, %s737_s27  ;;  %p741_p1 = scmp.lt.u32.totalorder %s737_s27, %s1043_s1 }
   0x8   :  { %p743_p2 = pnand %p741_p1, %p738_p0 }
   0xa   :  { %746 = shalt.err (!%p743_p2)
}
   0xb   :  { %s747_s8 = scalar_lea.vmem %s33_s22, 2048  ;;  %p752_p4 = scmp.lt.s32.totalorder %s33_s22, %s33_s22 }
   0xc   :  { %p748_p3 = scmp.ne.s32.totalorder %s33_s22, %s747_s8  ;;  %p753_p5 = scmp.lt.s32.totalorder %s747_s8, %s747_s8 }
   0xe   :  { %p754_p6 = por %p753_p5, %p752_p4 }
  0x10   :  { %p755_p7 = pnand %p754_p6, %p748_p3 }
  0x12   :  { %758 = shalt.err (!%p755_p7)
}
  0x13   :  { %s857_s9 = smov 128   ;;  %s858_s10 = smov 8  }
  0x14   :  { %38 = dma.hbm_to_vmem [thread:$0]  %s1043_s1, 2048, %s33_s22, [#allocation6], %s857_s9, %s857_s9, %s858_s10  }
  0x15   :  { %s759_s15 = scalar_lea.hbm %s1042_s0, 2048 }
  0x16   :  { %p760_p8 = scmp.ne.s32.totalorder %s1042_s0, %s759_s15  ;;  %p763_p9 = scmp.lt.u32.totalorder %s759_s15, %s1042_s0 }
  0x18   :  { %p765_p10 = pnand %p763_p9, %p760_p8 }
  0x1a   :  { %768 = shalt.err (!%p765_p10)
}
  0x1b   :  { %s769_s20 = scalar_lea.vmem %s897_s24, 2048  ;;  %p774_p12 = scmp.lt.s32.totalorder %s897_s24, %s897_s24 }
  0x1c   :  { %p770_p11 = scmp.ne.s32.totalorder %s897_s24, %s769_s20  ;;  %p775_p13 = scmp.lt.s32.totalorder %s769_s20, %s769_s20 }
  0x1e   :  { %p776_p0 = por %p775_p13, %p774_p12 }
  0x20   :  { %p777_p1 = pnand %p776_p0, %p770_p11 }
  0x22   :  { %780 = shalt.err (!%p777_p1)
}
  0x23   :  { %26 = dma.hbm_to_vmem [thread:$0]  %s1042_s0, 2048, %s897_s24, [#allocation3], %s857_s9, %s857_s9, %s858_s10  }
  0x24   :  { %s859_s22 = smov [#allocation7]   ;;  %s860_s25 = smov [#allocation8]  }
  0x25   :  { %s44_s23 = sshll.u32 %s859_s22, 4  ;;  %s58_s26 = sshll.u32 %s860_s25, 4  ;;  %s45_s23 = int_to_ptr.vmem [resolvable:$true] %s44_s23  ;;  %s934_s26 = int_to_ptr.vmem [resolvable:$true] %s58_s26 }
  0x26   :  { %s781_s29 = scalar_lea.hbm %s1044_s2, 256 }
  0x27   :  { %p782_p2 = scmp.ne.s32.totalorder %s1044_s2, %s781_s29  ;;  %p785_p3 = scmp.lt.u32.totalorder %s781_s29, %s1044_s2 }
  0x29   :  { %p787_p4 = pnand %p785_p3, %p782_p2 }
  0x2b   :  { %790 = shalt.err (!%p787_p4)
}
  0x2c   :  { %s791_s0 = scalar_lea.vmem %s45_s23, 256  ;;  %p796_p6 = scmp.lt.s32.totalorder %s45_s23, %s45_s23 }
  0x2d   :  { %p792_p5 = scmp.ne.s32.totalorder %s45_s23, %s791_s0  ;;  %p797_p7 = scmp.lt.s32.totalorder %s791_s0, %s791_s0 }
  0x2f   :  { %p798_p8 = por %p797_p7, %p796_p6 }
  0x31   :  { %p799_p9 = pnand %p798_p8, %p792_p5 }
  0x33   :  { %802 = shalt.err (!%p799_p9)
}
  0x34   :  { %50 = dma.hbm_to_vmem [thread:$0]  %s1044_s2, 256, %s45_s23, [#allocation6], %s857_s9, %s857_s9, %s858_s10  }
  0x35   :  { %s803_s15 = scalar_lea.hbm %s1046_s4, 512 }
  0x36   :  { %p804_p10 = scmp.ne.s32.totalorder %s1046_s4, %s803_s15  ;;  %p807_p11 = scmp.lt.u32.totalorder %s803_s15, %s1046_s4 }
  0x38   :  { %p809_p12 = pnand %p807_p11, %p804_p10 }
  0x3a   :  { %812 = shalt.err (!%p809_p12)
}
  0x3b   :  { %s813_s20 = scalar_lea.vmem %s934_s26, 512  ;;  %p818_p0 = scmp.lt.s32.totalorder %s934_s26, %s934_s26 }
  0x3c   :  { %p814_p13 = scmp.ne.s32.totalorder %s934_s26, %s813_s20  ;;  %p819_p1 = scmp.lt.s32.totalorder %s813_s20, %s813_s20 }
  0x3e   :  { %p820_p2 = por %p819_p1, %p818_p0 }
  0x40   :  { %p821_p3 = pnand %p820_p2, %p814_p13 }
  0x42   :  { %824 = shalt.err (!%p821_p3)
}
  0x43   :  { %64 = dma.hbm_to_vmem [thread:$0]  %s1046_s4, 512, %s934_s26, [#allocation9], %s857_s9, %s857_s9, %s858_s10  }
  0x44   :  { %847 = dma.done.wait [#allocation3], 2048  }
  0x45   :  { %848 = vsyncadd [#allocation3], 4294965248 }
  0x46   :  { %849 = dma.done.wait [#allocation6], 2304  }
  0x47   :  { %850 = vsyncadd [#allocation6], 4294964992 }
  0x48   :  { %851 = dma.done.wait [#allocation9], 512  }
  0x49   :  { %852 = vsyncadd [#allocation9], 4294966784  ;;  %vm113_vm0 = vcmask 130048   ;;  %v111_v0 = vld [vmem:[#allocation7] sm:$0xff]  ;;  %v112_v1 = vld [vmem:[#allocation7 + $0x8] sm:$0xff]  ;;  %vm357_vm1 = vcmask 261120  }
  0x4a   :  { %v95_v2 = vld [vmem:[#allocation5] sm:$0xff]  ;;  %v718_v3 = vpack.c.bf16 %v112_v1, %v111_v0  ;;  %v96_v4 = vld [vmem:[#allocation5 + $0x8] sm:$0xff]  ;;  %v97_v5 = vld [vmem:[#allocation5 + $0x10] sm:$0xff] }
  0x4b   :  { %662 = vmatprep.mubr.msk.f32.mxu0 %vm113_vm0, %v95_v2  ;;  %v346_v6 = vld [vmem:[#allocation8] sm:$0xff]  ;;  %v347_v7 = vld [vmem:[#allocation8 + $0x8] sm:$0xff]  ;;  %v99_v10 = vld [vmem:[#allocation5 + $0x20] sm:$0xff] }
  0x4c   :  { %719 = vmatprep.subr.bf16.mxu0 %v718_v3  ;;  %v722_v8 = vpack.c.bf16 %v347_v7, %v346_v6  ;;  %v98_v9 = vld [vmem:[#allocation5 + $0x18] sm:$0xff]  ;;  %v100_v11 = vld [vmem:[#allocation5 + $0x28] sm:$0xff]  ;;  %v101_v12 = vld [vmem:[#allocation5 + $0x30] sm:$0xff] }
  0x4d   :  { %721 = vmatpush3.bf16.msra.mxu0 %v718_v3  ;;  %v102_v13 = vld [vmem:[#allocation5 + $0x38] sm:$0xff]  ;;  %v103_v14 = vld [vmem:[#allocation5 + $0x40] sm:$0xff]  ;;  %v104_v15 = vld [vmem:[#allocation5 + $0x48] sm:$0xff] }
  0x4e   :  { %723 = vmatprep.subr.bf16.mxu1 %v722_v8  ;;  %v105_v16 = vld [vmem:[#allocation5 + $0x50] sm:$0xff]  ;;  %v106_v17 = vld [vmem:[#allocation5 + $0x58] sm:$0xff]  ;;  %v107_v18 = vld [vmem:[#allocation5 + $0x60] sm:$0xff] }
  0x4f   :  { %725 = vmatpush3.bf16.msra.mxu1 %v722_v8  ;;  %v108_v19 = vld [vmem:[#allocation5 + $0x68] sm:$0xff]  ;;  %v109_v20 = vld [vmem:[#allocation5 + $0x70] sm:$0xff]  ;;  %v110_v21 = vld [vmem:[#allocation5 + $0x78] sm:$0xff] }
  0x50   :  { %663 = vmatmul.mubr.msk.f32.vlgmr.msra.gmra.mrb[0].mxu0 %vm113_vm0, %v96_v4  ;;  %v348_v22 = vld [vmem:[#allocation8 + $0x10] sm:$0xff]  ;;  %v349_v23 = vld [vmem:[#allocation8 + $0x18] sm:$0xff]  ;;  %v82_v32 = vld [vmem:[#allocation2 + $0x18] sm:$0xff] }
  0x51   :  { %665 = vmatprep.mubr.msk.f32.mxu0 %vm113_vm0, %v97_v5  ;;  %v726_v24 = vpack.c.bf16 %v349_v23, %v348_v22  ;;  %v80_v25 = vld [vmem:[#allocation2 + $0x8] sm:$0xff]  ;;  %v79_v26 = vld [vmem:[#allocation2] sm:$0xff]  ;;  %v81_v33 = vld [vmem:[#allocation2 + $0x10] sm:$0xff] }
  0x52   :  { %v990_v29 = vld [vmem:[%s1045_s3] ss:$0 sm:$0xff]  ;;  %v84_v40 = vld [vmem:[#allocation2 + $0x28] sm:$0xff]  ;;  %v86_v48 = vld [vmem:[#allocation2 + $0x38] sm:$0xff] }
  0x53   :  { %727 = vmatprep.subr.bf16.mxu1 %v726_v24  ;;  %v83_v41 = vld [vmem:[#allocation2 + $0x20] sm:$0xff]  ;;  %v85_v49 = vld [vmem:[#allocation2 + $0x30] sm:$0xff]  ;;  %v88_v56 = vld [vmem:[#allocation2 + $0x48] sm:$0xff] }
  0x54   :  { %666 = vmatmul.mubr.msk.f32.gmra.mrb[2].mxu0 %vm113_vm0, %v98_v9  ;;  %729 = vmatpush3.bf16.msra.mxu1 %v726_v24  ;;  %v87_v57 = vld [vmem:[#allocation2 + $0x40] sm:$0xff]  ;;  %v90_v0 = vld [vmem:[#allocation2 + $0x58] sm:$0xff]  ;;  %v89_v1 = vld [vmem:[#allocation2 + $0x50] sm:$0xff] }
  0x55   :  { %668 = vmatprep.mubr.msk.f32.mxu0 %vm113_vm0, %v99_v10  ;;  %v92_v8 = vld [vmem:[#allocation2 + $0x68] sm:$0xff]  ;;  %v91_v9 = vld [vmem:[#allocation2 + $0x60] sm:$0xff] }
  0x58   :  { %669 = vmatmul.mubr.msk.f32.gmra.mrb[4].mxu0 %vm113_vm0, %v100_v11 }
  0x59   :  { %671 = vmatprep.mubr.msk.f32.mxu0 %vm113_vm0, %v101_v12 }
  0x5c   :  { %672 = vmatmul.mubr.msk.f32.gmra.mrb[6].mxu0 %vm113_vm0, %v102_v13 }
  0x5d   :  { %674 = vmatprep.mubr.msk.f32.mxu0 %vm113_vm0, %v103_v14 }
  0x60   :  { %675 = vmatmul.mubr.msk.f32.gmra.mrb[8].mxu0 %vm113_vm0, %v104_v15 }
  0x61   :  { %677 = vmatprep.mubr.msk.f32.mxu0 %vm113_vm0, %v105_v16  ;;  %v94_v16 = vld [vmem:[#allocation2 + $0x78] sm:$0xff] }
  0x64   :  { %678 = vmatmul.mubr.msk.f32.gmra.mrb[10].mxu0 %vm113_vm0, %v106_v17  ;;  %v93_v17 = vld [vmem:[#allocation2 + $0x70] sm:$0xff] }
  0x65   :  { %680 = vmatprep.mubr.msk.f32.mxu0 %vm113_vm0, %v107_v18 }
  0x68   :  { %681 = vmatmul.mubr.msk.f32.gmra.mrb[12].mxu0 %vm113_vm0, %v108_v19 }
  0x69   :  { %683 = vmatprep.mubr.msk.f32.mxu0 %vm113_vm0, %v109_v20 }
  0x6c   :  { %684 = vmatmul.mubr.msk.f32.gmra.mrb[14].mxu0 %vm113_vm0, %v110_v21 }
 0x123   :  { %v664_v27 = vpop.f32.mrb[0].mxu0 }
 0x124   :  { %v308_v28 = vadd.f32 %v664_v27, %v80_v25  ;;  %v228_v30 = vpop.f32.mrb[1].mxu0 }
 0x125   :  { %v307_v31 = vadd.f32 %v228_v30, %v79_v26  ;;  %v603_v26 = vld [vmem:[%s1047_s5] ss:$0 sm:$0xff]  ;;  %s861_s5 = smov [#allocation10]  }
 0x126   :  { %v331_v36 = vadd.f32 %v990_v29, %v308_v28  ;;  %s572_s23 = sshll.u32 %s861_s5, 4  ;;  %s573_s23 = int_to_ptr.vmem [resolvable:$true] %s572_s23 }
 0x127   :  { %v667_v34 = vpop.f32.mrb[2].mxu0  ;;  %v330_v35 = vadd.f32 %v990_v29, %v307_v31  ;;  %s825_s25 = scalar_lea.vmem %s573_s23, 2048  ;;  %p830_p5 = scmp.lt.s32.totalorder %s573_s23, %s573_s23 }
 0x128   :  { %v310_v37 = vadd.f32 %v667_v34, %v82_v32  ;;  %v238_v38 = vpop.f32.mrb[3].mxu0  ;;  %p826_p4 = scmp.ne.s32.totalorder %s573_s23, %s825_s25  ;;  %p831_p6 = scmp.lt.s32.totalorder %s825_s25, %s825_s25 }
 0x129   :  { %v309_v39 = vadd.f32 %v238_v38, %v81_v33  ;;  %694 = vmatprep.mubr.msk.f32.mxu1 %vm357_vm1, %v330_v35 }
 0x12a   :  { %695 = vmatmul.mubr.msk.f32.vlgmr.msra.gmra.mrb[0].mxu1 %vm357_vm1, %v331_v36  ;;  %v333_v44 = vadd.f32 %v990_v29, %v310_v37  ;;  %p832_p7 = por %p831_p6, %p830_p5 }
 0x12b   :  { %v332_v42 = vadd.f32 %v990_v29, %v309_v39  ;;  %v670_v43 = vpop.f32.mrb[4].mxu0 }
 0x12c   :  { %v312_v45 = vadd.f32 %v670_v43, %v84_v40  ;;  %v248_v46 = vpop.f32.mrb[5].mxu0  ;;  %p833_p8 = pnand %p832_p7, %p826_p4 }
 0x12d   :  { %v311_v47 = vadd.f32 %v248_v46, %v83_v41  ;;  %697 = vmatprep.mubr.msk.f32.mxu1 %vm357_vm1, %v332_v42 }
 0x12e   :  { %698 = vmatmul.mubr.msk.f32.gmra.mrb[2].mxu1 %vm357_vm1, %v333_v44  ;;  %v335_v52 = vadd.f32 %v990_v29, %v312_v45 }
 0x12f   :  { %v334_v50 = vadd.f32 %v990_v29, %v311_v47  ;;  %v673_v51 = vpop.f32.mrb[6].mxu0 }
 0x130   :  { %v314_v53 = vadd.f32 %v673_v51, %v86_v48  ;;  %v258_v54 = vpop.f32.mrb[7].mxu0 }
 0x131   :  { %v313_v55 = vadd.f32 %v258_v54, %v85_v49  ;;  %700 = vmatprep.mubr.msk.f32.mxu1 %vm357_vm1, %v334_v50 }
 0x132   :  { %701 = vmatmul.mubr.msk.f32.gmra.mrb[4].mxu1 %vm357_vm1, %v335_v52  ;;  %v337_v60 = vadd.f32 %v990_v29, %v314_v53 }
 0x133   :  { %v336_v58 = vadd.f32 %v990_v29, %v313_v55  ;;  %v676_v59 = vpop.f32.mrb[8].mxu0 }
 0x134   :  { %v316_v61 = vadd.f32 %v676_v59, %v88_v56  ;;  %v268_v62 = vpop.f32.mrb[9].mxu0 }
 0x135   :  { %v315_v63 = vadd.f32 %v268_v62, %v87_v57  ;;  %703 = vmatprep.mubr.msk.f32.mxu1 %vm357_vm1, %v336_v58 }
 0x136   :  { %704 = vmatmul.mubr.msk.f32.gmra.mrb[6].mxu1 %vm357_vm1, %v337_v60  ;;  %v339_v4 = vadd.f32 %v990_v29, %v316_v61 }
 0x137   :  { %v338_v2 = vadd.f32 %v990_v29, %v315_v63  ;;  %v679_v3 = vpop.f32.mrb[10].mxu0 }
 0x138   :  { %v318_v5 = vadd.f32 %v679_v3, %v90_v0  ;;  %v278_v6 = vpop.f32.mrb[11].mxu0 }
 0x139   :  { %v317_v7 = vadd.f32 %v278_v6, %v89_v1  ;;  %706 = vmatprep.mubr.msk.f32.mxu1 %vm357_vm1, %v338_v2 }
 0x13a   :  { %707 = vmatmul.mubr.msk.f32.gmra.mrb[8].mxu1 %vm357_vm1, %v339_v4  ;;  %v341_v12 = vadd.f32 %v990_v29, %v318_v5 }
 0x13b   :  { %v340_v10 = vadd.f32 %v990_v29, %v317_v7  ;;  %v682_v11 = vpop.f32.mrb[12].mxu0 }
 0x13c   :  { %v320_v13 = vadd.f32 %v682_v11, %v92_v8  ;;  %v288_v14 = vpop.f32.mrb[13].mxu0 }
 0x13d   :  { %v319_v15 = vadd.f32 %v288_v14, %v91_v9  ;;  %709 = vmatprep.mubr.msk.f32.mxu1 %vm357_vm1, %v340_v10 }
 0x13e   :  { %710 = vmatmul.mubr.msk.f32.gmra.mrb[10].mxu1 %vm357_vm1, %v341_v12  ;;  %v343_v20 = vadd.f32 %v990_v29, %v320_v13 }
 0x13f   :  { %v342_v18 = vadd.f32 %v990_v29, %v319_v15  ;;  %v685_v19 = vpop.f32.mrb[14].mxu0 }
 0x140   :  { %v322_v21 = vadd.f32 %v685_v19, %v94_v16  ;;  %v298_v22 = vpop.f32.mrb[15].mxu0 }
 0x141   :  { %v321_v23 = vadd.f32 %v298_v22, %v93_v17  ;;  %712 = vmatprep.mubr.msk.f32.mxu1 %vm357_vm1, %v342_v18 }
 0x142   :  { %713 = vmatmul.mubr.msk.f32.gmra.mrb[12].mxu1 %vm357_vm1, %v343_v20  ;;  %v345_v25 = vadd.f32 %v990_v29, %v322_v21 }
 0x143   :  { %v344_v24 = vadd.f32 %v990_v29, %v321_v23 }
 0x145   :  { %715 = vmatprep.mubr.msk.f32.mxu1 %vm357_vm1, %v344_v24 }
 0x146   :  { %716 = vmatmul.mubr.msk.f32.gmra.mrb[14].mxu1 %vm357_vm1, %v345_v25 }
 0x1fd   :  { %v696_v27 = vpop.f32.mrb[0].mxu1 }
 0x1fe   :  { %v478_v28 = vadd.f32 %v696_v27, %v603_v26  ;;  %v472_v30 = vpop.f32.mrb[1].mxu1 }
 0x1ff   :  { %v473_v31 = vadd.f32 %v603_v26, %v472_v30 }
 0x200   :  { %552 = vst [vmem:[#allocation10 + $0x8] sm:$0xff] %v478_v28 }
 0x201   :  { %551 = vst [vmem:[#allocation10] sm:$0xff] %v473_v31  ;;  %v699_v32 = vpop.f32.mrb[2].mxu1 }
 0x202   :  { %v488_v33 = vadd.f32 %v699_v32, %v603_v26  ;;  %v482_v34 = vpop.f32.mrb[3].mxu1 }
 0x203   :  { %v483_v35 = vadd.f32 %v603_v26, %v482_v34 }
 0x204   :  { %554 = vst [vmem:[#allocation10 + $0x18] sm:$0xff] %v488_v33 }
 0x205   :  { %553 = vst [vmem:[#allocation10 + $0x10] sm:$0xff] %v483_v35  ;;  %v702_v29 = vpop.f32.mrb[4].mxu1 }
 0x206   :  { %v498_v36 = vadd.f32 %v702_v29, %v603_v26  ;;  %v492_v37 = vpop.f32.mrb[5].mxu1 }
 0x207   :  { %v493_v38 = vadd.f32 %v603_v26, %v492_v37 }
 0x208   :  { %556 = vst [vmem:[#allocation10 + $0x28] sm:$0xff] %v498_v36 }
 0x209   :  { %555 = vst [vmem:[#allocation10 + $0x20] sm:$0xff] %v493_v38  ;;  %v705_v39 = vpop.f32.mrb[6].mxu1 }
 0x20a   :  { %v508_v40 = vadd.f32 %v705_v39, %v603_v26  ;;  %v502_v41 = vpop.f32.mrb[7].mxu1 }
 0x20b   :  { %v503_v42 = vadd.f32 %v603_v26, %v502_v41 }
 0x20c   :  { %558 = vst [vmem:[#allocation10 + $0x38] sm:$0xff] %v508_v40 }
 0x20d   :  { %557 = vst [vmem:[#allocation10 + $0x30] sm:$0xff] %v503_v42  ;;  %v708_v43 = vpop.f32.mrb[8].mxu1 }
 0x20e   :  { %v518_v44 = vadd.f32 %v708_v43, %v603_v26  ;;  %v512_v45 = vpop.f32.mrb[9].mxu1 }
 0x20f   :  { %v513_v46 = vadd.f32 %v603_v26, %v512_v45 }
 0x210   :  { %560 = vst [vmem:[#allocation10 + $0x48] sm:$0xff] %v518_v44 }
 0x211   :  { %559 = vst [vmem:[#allocation10 + $0x40] sm:$0xff] %v513_v46  ;;  %v711_v47 = vpop.f32.mrb[10].mxu1 }
 0x212   :  { %v528_v48 = vadd.f32 %v711_v47, %v603_v26  ;;  %v522_v49 = vpop.f32.mrb[11].mxu1 }
 0x213   :  { %v523_v50 = vadd.f32 %v603_v26, %v522_v49 }
 0x214   :  { %562 = vst [vmem:[#allocation10 + $0x58] sm:$0xff] %v528_v48 }
 0x215   :  { %561 = vst [vmem:[#allocation10 + $0x50] sm:$0xff] %v523_v50  ;;  %v714_v51 = vpop.f32.mrb[12].mxu1 }
 0x216   :  { %v538_v52 = vadd.f32 %v714_v51, %v603_v26  ;;  %v532_v53 = vpop.f32.mrb[13].mxu1 }
 0x217   :  { %v533_v54 = vadd.f32 %v603_v26, %v532_v53 }
 0x218   :  { %564 = vst [vmem:[#allocation10 + $0x68] sm:$0xff] %v538_v52 }
 0x219   :  { %563 = vst [vmem:[#allocation10 + $0x60] sm:$0xff] %v533_v54  ;;  %v717_v55 = vpop.f32.mrb[14].mxu1 }
 0x21a   :  { %v548_v56 = vadd.f32 %v717_v55, %v603_v26  ;;  %v542_v57 = vpop.f32.mrb[15].mxu1 }
 0x21b   :  { %v543_v58 = vadd.f32 %v603_v26, %v542_v57 }
 0x21c   :  { %566 = vst [vmem:[#allocation10 + $0x78] sm:$0xff] %v548_v56 }
 0x21d   :  { %565 = vst [vmem:[#allocation10 + $0x70] sm:$0xff] %v543_v58 }
 0x21e   :  { %836 = shalt.err (!%p833_p8)
}
 0x21f   :  { %s837_s28 = scalar_lea.hbm %s1048_s6, 2048 }
 0x220   :  { %p838_p9 = scmp.ne.s32.totalorder %s1048_s6, %s837_s28  ;;  %p841_p10 = scmp.lt.u32.totalorder %s837_s28, %s1048_s6 }
 0x222   :  { %p843_p11 = pnand %p841_p10, %p838_p9 }
 0x224   :  { %846 = shalt.err (!%p843_p11)
}
 0x225   :  { %578 = dma.vmem_to_hbm [thread:$0]  %s573_s23, 2048, %s1048_s6, [#allocation4], %s857_s9, %s857_s9, %s858_s10  }
 0x226   :  { %853 = dma.done.wait [#allocation4], 2048  }
 0x227   :  { %854 = vsyncadd [#allocation4], 4294965248 }
 0x228   :  { %582 = vsyncpa [#allocation3], 1 }
 0x229   :  { %583 = vsyncpa [#allocation6], 1 }
 0x22a   :  { %584 = vsyncpa [#allocation9], 1 }
 0x22b   :  { %585 = vsyncpa [#allocation4], 1 }

</bundles_post_ra>
